<compile_context>
chip_gen: v6e
topology: v6e:2x2x1
jax: 0.10.0
libtpu: 0.0.40
codegen_flags: <defaults>
</compile_context>

<pallas_src>
import functools

import jax
import jax.numpy as jnp
from jax.experimental import pallas as pl
from jax.experimental.pallas import tpu as pltpu

LANE = 128          # vreg lane width
SUBLANE_BF16 = 16   # bf16 packs two rows per sublane


def _round_up(n: int, m: int) -> int:
    return (n + m - 1) // m * m


def _vmem_limit_bytes() -> int:
    """Per-generation scoped-VMEM budget with headroom for Mosaic scratch."""
    cap = None
    try:
        cap = getattr(pltpu.get_tpu_info(), "vmem_capacity_bytes", None)
    except Exception:
        cap = None
    if not cap:
        kind = ""
        try:
            kind = jax.devices()[0].device_kind.lower()
        except Exception:
            pass
        # v5e / v6e have 128 MiB physical VMEM per TC; otherwise assume the
        # v7x-safe 64 MiB.
        cap = 128 * 1024 * 1024 if ("v5" in kind or "v6" in kind) else 64 * 1024 * 1024
    # ~80% of physical, capped — leaves room for Mosaic internal scratch and
    # the double-buffered x/out tiles.
    return min(int(cap * 0.8), 112 * 1024 * 1024)


def materialize_mlp_params(w1, b1, w2, b2, *, tile_h: int = 512, tile_n: int = 512,
                           compute_dtype=jnp.bfloat16):
    """One-time pad + cast of the materialized weights (hoisted out of forward)."""
    b1 = jnp.asarray(b1).reshape(1, -1)
    b2 = jnp.asarray(b2).reshape(1, -1)
    d_in, d_h = w1.shape
    d_out = w2.shape[1]
    assert w2.shape[0] == d_h and b1.shape[1] == d_h and b2.shape[1] == d_out

    d_in_p = _round_up(d_in, LANE)
    tk = min(tile_h, _round_up(d_h, LANE))       # hidden-dim tile (multiple of 128)
    tn = min(tile_n, _round_up(d_out, LANE))     # output-dim tile (multiple of 128)
    d_h_p = _round_up(d_h, tk)
    d_out_p = _round_up(d_out, tn)

    return dict(
        w1=jnp.pad(w1, ((0, d_in_p - d_in), (0, d_h_p - d_h))).astype(compute_dtype),
        b1=jnp.pad(b1.astype(jnp.float32), ((0, 0), (0, d_h_p - d_h))),
        w2=jnp.pad(w2, ((0, d_h_p - d_h), (0, d_out_p - d_out))).astype(compute_dtype),
        b2=jnp.pad(b2.astype(jnp.float32), ((0, 0), (0, d_out_p - d_out))),
        d_in=d_in, d_out=d_out, tk=tk, tn=tn,
    )


def mlp_kernel(x_ref, w1_ref, b1_ref, w2_ref, b2_ref, o_ref, acc_ref):
    k = pl.program_id(2)

    @pl.when(k == 0)
    def _init():
        acc_ref[...] = jnp.zeros_like(acc_ref)

    # First matmul + bias + relu for this hidden tile. The bf16 cast of x is
    # in-kernel VPU work (hidden under the MXU) rather than a wrapper HBM pass.
    xb = x_ref[...].astype(w1_ref.dtype)
    h = jnp.dot(xb, w1_ref[...], preferred_element_type=jnp.float32)
    h = jnp.maximum(h + b1_ref[...], 0.0)

    # Second matmul: accumulate this hidden tile's contribution in f32.
    acc_ref[...] += jnp.dot(h.astype(w2_ref.dtype), w2_ref[...],
                            preferred_element_type=jnp.float32)

    @pl.when(k == pl.num_programs(2) - 1)
    def _finalize():
        o_ref[...] = (acc_ref[...] + b2_ref[...]).astype(o_ref.dtype)


def materialized_model_forward(params, x, *, block_b: int = 512,
                               out_dtype=jnp.float32):
    """Fused relu(x@W1+b1)@W2+b2 using the pre-materialized (padded) params."""
    w1, b1, w2, b2 = params["w1"], params["b1"], params["w2"], params["b2"]
    d_in, d_out = params["d_in"], params["d_out"]
    tk, tn = params["tk"], params["tn"]

    B, din = x.shape
    assert din == d_in, "input feature dim mismatch with materialized weights"
    d_in_p, d_h_p = w1.shape
    d_out_p = w2.shape[1]

    # Batch tile: large by default (HBM roofline, 256-row MXU on v6e/v7x),
    # bf16-sublane aligned; ensure >= 2 tiles when possible so a v7x megacore
    # has work for both TensorCores.
    tb = _round_up(min(block_b, _round_up(B, SUBLANE_BF16)), SUBLANE_BF16)
    if B > SUBLANE_BF16 and pl.cdiv(_round_up(B, SUBLANE_BF16), tb) < 2:
        tb = _round_up(max(SUBLANE_BF16, _round_up(B, SUBLANE_BF16) // 2),
                       SUBLANE_BF16)
    B_p = _round_up(B, tb)

    # Only pad x when actually needed (the bf16 cast happens in-kernel).
    if B_p != B or d_in_p != din:
        x_in = jnp.pad(x, ((0, B_p - B), (0, d_in_p - din)))
    else:
        x_in = x

    n_i = B_p // tb
    n_j = d_out_p // tn
    n_k = d_h_p // tk

    def spec(shape, index_map, grid_invariant):
        # Grid-invariant blocks don't need double-buffering: halve their VMEM.
        if grid_invariant:
            return pl.BlockSpec(shape, index_map, pipeline_mode=pl.Buffered(1))
        return pl.BlockSpec(shape, index_map)

    out_padded = pl.pallas_call(
        mlp_kernel,
        out_shape=jax.ShapeDtypeStruct((B_p, d_out_p), out_dtype),
        grid_spec=pltpu.PrefetchScalarGridSpec(
            num_scalar_prefetch=0,
            grid=(n_i, n_j, n_k),
            in_specs=[
                # activations: batch tile, resident across (j, k)
                pl.BlockSpec((tb, d_in_p), lambda i, j, k: (i, 0)),
                # W1 column block / b1 slice for hidden tile k
                spec((d_in_p, tk), lambda i, j, k: (0, k), n_k == 1),
                spec((1, tk), lambda i, j, k: (0, k), n_k == 1),
                # W2 block (hidden tile k -> dout tile j) / b2 slice
                spec((tk, tn), lambda i, j, k: (k, j), n_k == 1 and n_j == 1),
                spec((1, tn), lambda i, j, k: (0, j), n_j == 1),
            ],
            out_specs=pl.BlockSpec((tb, tn), lambda i, j, k: (i, j)),
            scratch_shapes=[pltpu.VMEM((tb, tn), jnp.float32)],
        ),
        compiler_params=pltpu.CompilerParams(
            # batch / dout tiles independent; hidden axis is the reduction.
            dimension_semantics=("parallel", "parallel", "arbitrary"),
            vmem_limit_bytes=_vmem_limit_bytes(),
        ),
    )(x_in, w1, b1, w2, b2)

    if B_p == B and d_out_p == d_out:
        return out_padded
    return out_padded[:B, :d_out]


def reference_forward(x, w1, b1, w2, b2, compute_dtype=jnp.bfloat16):
    # Same dtype policy as the kernel (bf16 operands, f32 accumulation).
    h = jnp.dot(x.astype(compute_dtype), w1.astype(compute_dtype),
                preferred_element_type=jnp.float32)
    h = jnp.maximum(h + b1.astype(jnp.float32).reshape(1, -1), 0.0)
    y = jnp.dot(h.astype(compute_dtype), w2.astype(compute_dtype),
                preferred_element_type=jnp.float32)
    return y + b2.astype(jnp.float32).reshape(1, -1)


if __name__ == "__main__":
    key = jax.random.PRNGKey(0)
    kx, k1, k2, k3, k4 = jax.random.split(key, 5)

    # Small logical shapes consistent with a materialized MLP.
    batch, d_in, d_hidden, d_out = 32, 32, 64, 16

    x = jax.random.normal(kx, (batch, d_in), dtype=jnp.float32)
    # Deterministic "materialized" parameters (synthetic, not a checkpoint).
    w1 = jax.random.normal(k1, (d_in, d_hidden), dtype=jnp.float32) * 0.1
    b1 = jax.random.normal(k2, (d_hidden,), dtype=jnp.float32) * 0.05
    w2 = jax.random.normal(k3, (d_hidden, d_out), dtype=jnp.float32) * 0.1
    b2 = jax.random.normal(k4, (d_out,), dtype=jnp.float32) * 0.05

    # One-time materialization (pad + bf16 cast of weights, hoisted out of fwd).
    params = materialize_mlp_params(w1, b1, w2, b2)

    fwd = jax.jit(lambda xx: materialized_model_forward(xx_params, xx)) \
        if False else jax.jit(
            functools.partial(lambda p, xx: materialized_model_forward(p, xx),
                              params))
    out = jax.block_until_ready(fwd(x))

    ref = reference_forward(x, w1, b1, w2, b2)
    assert out.shape == (batch, d_out)
    assert jnp.allclose(out, ref, atol=1e-3, rtol=1e-3), "mismatch vs bf16 reference"

    # Also sanity-check against pure-f32 math (loose tol for bf16 operands).
    ref_f32 = jnp.maximum(x @ w1 + b1[None, :], 0.0) @ w2 + b2[None, :]
    assert jnp.allclose(out, ref_f32, atol=5e-2, rtol=5e-2), "mismatch vs f32 reference"

    print("KERNEL_OK")
</pallas_src>

<mosaic_0001>
module attributes {stable_mosaic.version = 11 : i64} {
  func.func @mlp_kernel(%arg0: i32, %arg1: i32, %arg2: i32, %arg3: memref<16x128xf32, #tpu.memory_space<vmem>>, %arg4: memref<128x128xbf16, #tpu.memory_space<vmem>>, %arg5: memref<1x128xf32, #tpu.memory_space<vmem>>, %arg6: memref<128x128xbf16, #tpu.memory_space<vmem>>, %arg7: memref<1x128xf32, #tpu.memory_space<vmem>>, %arg8: memref<16x128xf32, #tpu.memory_space<vmem>>, %arg9: memref<16x128xf32, #tpu.memory_space<vmem>>) attributes {dimension_semantics = [#tpu.dimension_semantics<parallel>, #tpu.dimension_semantics<parallel>, #tpu.dimension_semantics<arbitrary>], iteration_bounds = array<i64: 2, 1, 1>, scalar_prefetch = 0 : i64, scratch_operands = 1 : i64, tpu.core_type = #tpu.core_type<tc>, window_params = [{transform_indices = @transform_0, window_bounds = array<i64: 16, 128>}, {pipeline_mode = #tpu.pipeline_mode<synchronous>, transform_indices = @transform_1, window_bounds = array<i64: 128, 128>}, {pipeline_mode = #tpu.pipeline_mode<synchronous>, transform_indices = @transform_2, window_bounds = array<i64: 1, 128>}, {pipeline_mode = #tpu.pipeline_mode<synchronous>, transform_indices = @transform_3, window_bounds = array<i64: 128, 128>}, {pipeline_mode = #tpu.pipeline_mode<synchronous>, transform_indices = @transform_4, window_bounds = array<i64: 1, 128>}, {transform_indices = @transform_5, window_bounds = array<i64: 16, 128>}]} {
    %c0_i32 = arith.constant 0 : i32
    %0 = arith.cmpi eq, %arg2, %c0_i32 : i32
    %1 = arith.extui %0 : i1 to i32
    %c0_i32_0 = arith.constant 0 : i32
    %2 = arith.cmpi ne, %1, %c0_i32_0 : i32
    scf.if %2 {
      %cst_16 = arith.constant 0.000000e+00 : f32
      %21 = vector.broadcast %cst_16 : f32 to vector<16x128xf32>
      %c0_17 = arith.constant 0 : index
      %c0_18 = arith.constant 0 : index
      %22 = vector.load %arg9[%c0_17, %c0_18] : memref<16x128xf32, #tpu.memory_space<vmem>>, vector<16x128xf32>
      tpu.vector_store %arg9[%c0_17, %c0_18], %21 {strides = array<i32>} : memref<16x128xf32, #tpu.memory_space<vmem>>, vector<16x128xf32>,
    } else {
    }
    %c0 = arith.constant 0 : index
    %c0_1 = arith.constant 0 : index
    %3 = vector.load %arg3[%c0, %c0_1] : memref<16x128xf32, #tpu.memory_space<vmem>>, vector<16x128xf32>
    %4 = arith.truncf %3 : vector<16x128xf32> to vector<16x128xbf16>
    %c0_2 = arith.constant 0 : index
    %c0_3 = arith.constant 0 : index
    %5 = vector.load %arg4[%c0_2, %c0_3] : memref<128x128xbf16, #tpu.memory_space<vmem>>, vector<128x128xbf16>
    %cst = arith.constant dense<0.000000e+00> : vector<16x128xf32>
    %6 = tpu.matmul %4, %5, %cst {dimension_numbers = #tpu.dot_dimension_numbers<[1], [0], [0], [1], [0, 0, 1, 1], [], []>} : vector<16x128xbf16>, vector<128x128xbf16>, vector<16x128xf32> -> vector<16x128xf32>
    %c0_4 = arith.constant 0 : index
    %c0_5 = arith.constant 0 : index
    %7 = vector.load %arg5[%c0_4, %c0_5] : memref<1x128xf32, #tpu.memory_space<vmem>>, vector<1x128xf32>
    %8 = vector.broadcast %7 : vector<1x128xf32> to vector<16x128xf32>
    %9 = arith.addf %6, %8 : vector<16x128xf32>
    %cst_6 = arith.constant 0.000000e+00 : f32
    %10 = vector.broadcast %cst_6 : f32 to vector<16x128xf32>
    %11 = arith.maximumf %9, %10 : vector<16x128xf32>
    %c0_7 = arith.constant 0 : index
    %c0_8 = arith.constant 0 : index
    %12 = vector.load %arg9[%c0_7, %c0_8] : memref<16x128xf32, #tpu.memory_space<vmem>>, vector<16x128xf32>
    %13 = arith.truncf %11 : vector<16x128xf32> to vector<16x128xbf16>
    %c0_9 = arith.constant 0 : index
    %c0_10 = arith.constant 0 : index
    %14 = vector.load %arg6[%c0_9, %c0_10] : memref<128x128xbf16, #tpu.memory_space<vmem>>, vector<128x128xbf16>
    %cst_11 = arith.constant dense<0.000000e+00> : vector<16x128xf32>
    %15 = tpu.matmul %13, %14, %cst_11 {dimension_numbers = #tpu.dot_dimension_numbers<[1], [0], [0], [1], [0, 0, 1, 1], [], []>} : vector<16x128xbf16>, vector<128x128xbf16>, vector<16x128xf32> -> vector<16x128xf32>
    %16 = arith.addf %12, %15 : vector<16x128xf32>
    %c0_12 = arith.constant 0 : index
    %c0_13 = arith.constant 0 : index
    %17 = vector.load %arg9[%c0_12, %c0_13] : memref<16x128xf32, #tpu.memory_space<vmem>>, vector<16x128xf32>
    tpu.vector_store %arg9[%c0_12, %c0_13], %16 {strides = array<i32>} : memref<16x128xf32, #tpu.memory_space<vmem>>, vector<16x128xf32>,
    %c0_i32_14 = arith.constant 0 : i32
    %18 = arith.cmpi eq, %arg2, %c0_i32_14 : i32
    %19 = arith.extui %18 : i1 to i32
    %c0_i32_15 = arith.constant 0 : i32
    %20 = arith.cmpi ne, %19, %c0_i32_15 : i32
    scf.if %20 {
      %c0_16 = arith.constant 0 : index
      %c0_17 = arith.constant 0 : index
      %21 = vector.load %arg9[%c0_16, %c0_17] : memref<16x128xf32, #tpu.memory_space<vmem>>, vector<16x128xf32>
      %c0_18 = arith.constant 0 : index
      %c0_19 = arith.constant 0 : index
      %22 = vector.load %arg7[%c0_18, %c0_19] : memref<1x128xf32, #tpu.memory_space<vmem>>, vector<1x128xf32>
      %23 = vector.broadcast %22 : vector<1x128xf32> to vector<16x128xf32>
      %24 = arith.addf %21, %23 : vector<16x128xf32>
      %c0_20 = arith.constant 0 : index
      %c0_21 = arith.constant 0 : index
      %25 = vector.load %arg8[%c0_20, %c0_21] : memref<16x128xf32, #tpu.memory_space<vmem>>, vector<16x128xf32>
      tpu.vector_store %arg8[%c0_20, %c0_21], %24 {strides = array<i32>} : memref<16x128xf32, #tpu.memory_space<vmem>>, vector<16x128xf32>,
    } else {
    }
    return
  }
  func.func @transform_0(%arg0: i32, %arg1: i32, %arg2: i32) -> (i32, i32) {
    %c0_i32 = arith.constant 0 : i32
    %c0_i32_0 = arith.constant 0 : i32
    return %arg0, %c0_i32 : i32, i32
  }
  func.func @transform_1(%arg0: i32, %arg1: i32, %arg2: i32) -> (i32, i32) {
    %c0_i32 = arith.constant 0 : i32
    %c0_i32_0 = arith.constant 0 : i32
    return %c0_i32, %arg2 : i32, i32
  }
  func.func @transform_2(%arg0: i32, %arg1: i32, %arg2: i32) -> (i32, i32) {
    %c0_i32 = arith.constant 0 : i32
    %c0_i32_0 = arith.constant 0 : i32
    return %c0_i32, %arg2 : i32, i32
  }
  func.func @transform_3(%arg0: i32, %arg1: i32, %arg2: i32) -> (i32, i32) {
    %c0_i32 = arith.constant 0 : i32
    return %arg2, %arg1 : i32, i32
  }
  func.func @transform_4(%arg0: i32, %arg1: i32, %arg2: i32) -> (i32, i32) {
    %c0_i32 = arith.constant 0 : i32
    %c0_i32_0 = arith.constant 0 : i32
    return %c0_i32, %arg1 : i32, i32
  }
  func.func @transform_5(%arg0: i32, %arg1: i32, %arg2: i32) -> (i32, i32) {
    %c0_i32 = arith.constant 0 : i32
    return %arg0, %arg1 : i32, i32
  }
}

</mosaic_0001>

<bundles_post_ra>
// kernel: _lambda_.1
= control target key start
LH: loop header
LB: loop body
LE: loop exit
PB: predicated region body
PF: predicated region fallthrough
CT: control target
= control target key end

     0   :  { %10 = vsyncpa [#allocation4], 0  ;;  %s960_s18 = smov 0   ;;  %s962_s19 = smov 0   ;;  %s1055_s0 = inlined_call_operand.vmem [shape: f32[32,128], index: 0, kind: input, shape index: {}]   ;;  %s1056_s1 = inlined_call_operand.hbm [shape: bf16[128,128], index: 1, kind: input, shape index: {}]   ;;  %s1057_s2 = inlined_call_operand.vmem [shape: f32[1,128], index: 2, kind: input, shape index: {}]   ;;  %s1058_s3 = inlined_call_operand.vmem [shape: bf16[128,128], index: 3, kind: input, shape index: {}]   ;;  %s1059_s4 = inlined_call_operand.vmem [shape: f32[1,128], index: 4, kind: input, shape index: {}]   ;;  %s1060_s5 = inlined_call_operand.vmem [shape: f32[32,128], index: 5, kind: output, shape index: {}]  }
   0x1   :  { %s964_s20 = smov 0  }
   0x2 LB: > { %s724_s21 = sadd.s32 4294967295, %s923_s20   ;;  %s35_s22 = sadd.s32 1, %s919_s19  ;;  %s923_s20 = sphi %s964_s20, %s16_s20   ;;  %s919_s19 = sphi %s962_s19, %s1064_s19   ;;  %s915_s18 = sphi %s960_s18, %s1063_s18  }
   0x3   : > { %p37_p0 = scmp.ge.s32.totalorder %s35_s22, 2  ;;  %p726_p1 = scmp.ge.s32.totalorder %s923_s20, 1 }
   0x4   : > { %p200_p2 = scmp.lt.s32.totalorder %s923_s20, 3  ;;  %p985_p4 = scmp.eq.s32.totalorder %s724_s21, 0 }
   0x5   : > { %s1066_s22 = smov (%p37_p0, %s35_s22), 0  ;;  %s925_s25 = smov [#allocation3]  }
   0x6   : > { %p981_p3 = pnand %p726_p1, %p200_p2  ;;  %s214_s26 = sshll.u32 %s925_s25, 4  ;;  %s215_s26 = int_to_ptr.vmem [resolvable:$true] %s214_s26 }
   0x7   : > { %s882_s27 = scalar_lea.vmem %s215_s26, 1024  ;;  %p890_p11 = scmp.lt.s32.totalorder %s215_s26, %s215_s26 }
   0x8   : > { %p820_p5 = pneg %p981_p3  ;;  %p883_p8 = scmp.ne.s32.totalorder %s215_s26, %s882_s27 }
   0x9   : > { %p891_p12 = scmp.lt.s32.totalorder %s882_s27, %s882_s27 }
   0xa   : > { %p821_p6 = pnand %p985_p4, %p820_p5 }
   0xb   : > { %p892_p13 = por %p891_p12, %p890_p11 }
   0xc   : > { %p873_p7 = pneg %p821_p6 }
   0xe   : > { %p885_p9 = pnand %p883_p8, %p873_p7 }
  0x10   : > { %p886_p10 = pneg %p885_p9 }
  0x12   : > { %p893_p0 = pnand %p892_p13, %p886_p10 }
  0x14   : > { %896 = shalt.err (!%p893_p0)
}
  0x15   : > { %s926_s28 = smov 64   ;;  %s927_s29 = smov 4  }
  0x16   : > { %823 = dma.hbm_to_vmem [thread:$0]  (!%p821_p6), %s1056_s1, 1024, %s215_s26, [#allocation4], %s926_s28, %s926_s28, %s927_s29  }
  0x17   : > { %263 = sbr.rel (%p981_p3) target bundleno = 466 (0x1d2), region = 40 }
  0x1c   : > { %910 = dma.done.wait (%p985_p4), [#allocation4], 1024  }
  0x1d   : > { %912 = vsyncadd (%p985_p4), [#allocation4], 4294966272  ;;  %v928_v0 = vmov 0.0   ;;  %vm929_vm0 = vmmov 0   ;;  %v855_v1 = vld [vmem:[#allocation3 + $0x38] sm:$0xff]   ;;  %v856_v2 = vld [vmem:[#allocation3 + $0x30] sm:$0xff]  }
  0x1e   : > { %776 = vmatprep.subr.bf16.mxu0 %v928_v0  ;;  %792 = vmatprep.mubr.msk.bf16.mxu0 %vm929_vm0, %v928_v0  ;;  %v857_v3 = vld [vmem:[#allocation3 + $0x28] sm:$0xff]   ;;  %s734_s7 = sshll.u32 %s915_s18, 1  ;;  %v863_v4 = vld [vmem:[%s1058_s3 + $0x38] sm:$0xff]   ;;  %v858_v5 = vld [vmem:[#allocation3 + $0x20] sm:$0xff]  }
  0x1f   : > { %796 = vmatprep.subr.bf16.mxu1 %v928_v0  ;;  %812 = vmatprep.mubr.msk.bf16.mxu1 %vm929_vm0, %v928_v0  ;;  %v864_v6 = vld [vmem:[%s1058_s3 + $0x30] sm:$0xff]   ;;  %p309_p1 = scmp.lt.s32.totalorder %s734_s7, 3  ;;  %v859_v7 = vld [vmem:[#allocation3 + $0x18] sm:$0xff]   ;;  %v865_v8 = vld [vmem:[%s1058_s3 + $0x28] sm:$0xff]  }
  0x20   : > { %777 = vmatpush3.bf16.msra.mxu0 %v855_v1  ;;  %797 = vmatpush3.bf16.msra.mxu1 %v863_v4  ;;  %v860_v9 = vld [vmem:[#allocation3 + $0x10] sm:$0xff]   ;;  %v866_v10 = vld [vmem:[%s1058_s3 + $0x20] sm:$0xff]   ;;  %v861_v11 = vld [vmem:[#allocation3 + $0x8] sm:$0xff]  }
  0x21   : > { %778 = vmatprep.subr.bf16.mxu0 %v928_v0  ;;  %798 = vmatprep.subr.bf16.mxu1 %v928_v0  ;;  %s1068_s7 = smov (!%p309_p1, %s734_s7), 3  ;;  %v867_v12 = vld [vmem:[%s1058_s3 + $0x18] sm:$0xff]   ;;  %v862_v13 = vld [vmem:[#allocation3] sm:$0xff]   ;;  %v868_v17 = vld [vmem:[%s1058_s3 + $0x10] sm:$0xff]  }
  0x22   : > { %s735_s16 = sshll.u32 %s1068_s7, 3  ;;  %v869_v18 = vld [vmem:[%s1058_s3 + $0x8] sm:$0xff]   ;;  %v870_v19 = vld [vmem:[%s1058_s3] sm:$0xff]  }
  0x23   : > { %s312_s21 = scalar_lea.vmem %s1055_s0, %s735_s16  ;;  %v738_v20 = vld [vmem:[%s1057_s2] ss:$0 sm:$0xff]  ;;  %s336_s13 = scalar_lea.vmem %s1060_s5, %s735_s16 }
  0x24   : > { %779 = vmatpush3.bf16.msra.mxu0 %v856_v2  ;;  %799 = vmatpush3.bf16.msra.mxu1 %v864_v6  ;;  %v345_v14 = vld [vmem:[%s312_s21] sm:$0xff]  ;;  %v346_v15 = vld [vmem:[%s312_s21 + $0x8] sm:$0xff] }
  0x25   : > { %780 = vmatprep.subr.bf16.mxu0 %v928_v0  ;;  %800 = vmatprep.subr.bf16.mxu1 %v928_v0  ;;  %v347_v16 = vpack.c.bf16 %v346_v15, %v345_v14  ;;  %v755_v30 = vld [vmem:[%s1059_s4] ss:$0 sm:$0xff] }
  0x28   : > { %781 = vmatpush3.bf16.msra.mxu0 %v857_v3  ;;  %801 = vmatpush3.bf16.msra.mxu1 %v865_v8 }
  0x29   : > { %782 = vmatprep.subr.bf16.mxu0 %v928_v0  ;;  %802 = vmatprep.subr.bf16.mxu1 %v928_v0 }
  0x2c   : > { %783 = vmatpush3.bf16.msra.mxu0 %v858_v5  ;;  %803 = vmatpush3.bf16.msra.mxu1 %v866_v10 }
  0x2d   : > { %784 = vmatprep.subr.bf16.mxu0 %v928_v0  ;;  %804 = vmatprep.subr.bf16.mxu1 %v928_v0 }
  0x30   : > { %785 = vmatpush3.bf16.msra.mxu0 %v859_v7  ;;  %805 = vmatpush3.bf16.msra.mxu1 %v867_v12 }
  0x31   : > { %786 = vmatprep.subr.bf16.mxu0 %v928_v0  ;;  %806 = vmatprep.subr.bf16.mxu1 %v928_v0 }
  0x34   : > { %787 = vmatpush3.bf16.msra.mxu0 %v860_v9  ;;  %807 = vmatpush3.bf16.msra.mxu1 %v868_v17 }
  0x35   : > { %788 = vmatprep.subr.bf16.mxu0 %v928_v0  ;;  %808 = vmatprep.subr.bf16.mxu1 %v928_v0 }
  0x38   : > { %789 = vmatpush3.bf16.msra.mxu0 %v861_v11  ;;  %809 = vmatpush3.bf16.msra.mxu1 %v869_v18 }
  0x39   : > { %790 = vmatprep.subr.bf16.mxu0 %v928_v0  ;;  %810 = vmatprep.subr.bf16.mxu1 %v928_v0 }
  0x3c   : > { %791 = vmatpush3.bf16.msra.mxu0 %v862_v13  ;;  %811 = vmatpush3.bf16.msra.mxu1 %v870_v19 }
  0x3f   : > { %793 = vmatmul.mubr.bf16.vlgmr.msra.gmra.mxu0 %v347_v16 }
  0xff   : > { %v453_v21 = vpop.f32.mrf.mxu0 }
 0x100   : > { %v454_v23 = vadd.f32 %v738_v20, %v453_v21 }
 0x101   : > { %v794_v22 = vpop.f32.mrf.mxu0 }
 0x102   : > { %v460_v27 = vmax.f32 %v454_v23, 0.0 }
 0x103   : > { %v456_v24 = vpop.f32.mrf.mxu0 }
 0x104   : > { %v457_v25 = vadd.f32 %v738_v20, %v456_v24 }
 0x105   : > { %v795_v26 = vpop.f32.mrf.mxu0 }
 0x106   : > { %v461_v28 = vmax.f32 %v457_v25, 0.0 }
 0x108   : > { %v464_v29 = vpack.c.bf16 %v461_v28, %v460_v27 }
 0x10a   : > { %813 = vmatmul.mubr.bf16.vlgmr.msra.gmra.mxu1 %v464_v29 }
 0x1ca   : > { %v563_v31 = vpop.f32.mrf.mxu1 }
 0x1cb   : > { %v586_v32 = vadd.f32 %v755_v30, %v563_v31 }
 0x1cc   : > { %v814_v33 = vpop.f32.mrf.mxu1 }
 0x1cd   : > { %588 = vst [vmem:[%s336_s13] sm:$0xff] %v586_v32 }
 0x1ce   : > { %v566_v34 = vpop.f32.mrf.mxu1 }
 0x1cf   : > { %v587_v35 = vadd.f32 %v755_v30, %v566_v34 }
 0x1d0   : > { %v815_v36 = vpop.f32.mrf.mxu1 }
 0x1d1   : > { %589 = vst [vmem:[%s336_s13 + $0x8] sm:$0xff] %v587_v35 }
 0x1d2 PF: > { %s16_s20 = sadd.s32 1, %s923_s20   ;;  %s1063_s18 = smov %s919_s19 }
 0x1d3   : > { %p13_p2 = scmp.ge.s32.totalorder %s16_s20, 4   ;;  %s1064_s19 = smov %s1066_s22 }
 0x1d5   :  { %15 = sbr.rel (!%p13_p2) target bundleno = 2 (0x2), region = 93 }
 0x1da   :  { %618 = vsyncpa [#allocation4], 1 }
 0x1db   :  { %620 = vsyncpa [#allocation4 + $0x1], 1 }

</bundles_post_ra>
